<compile_context>
chip_gen: v6e
topology: v6e:2x2x1
jax: 0.10.0
libtpu: 0.0.40
codegen_flags: <defaults>
</compile_context>

<pallas_src>
import functools

import numpy as np

import jax
import jax.numpy as jnp
from jax.experimental import pallas as pl
from jax.experimental.pallas import tpu as pltpu

_LANE = 128  # vreg lane width; pad the head axis to this so loads are unmasked


def _mt_loss_kernel(x_ref, out_ref):
    """x_ref: (2, Hpad) f32 VMEM (row 0 = losses, row 1 = log_vars).
    out_ref: (1, 1) f32 SMEM scalar result."""
    l = x_ref[0:1, :]                              # (1, Hpad) per-head losses
    lv = x_ref[1:2, :]                             # (1, Hpad) per-head log-variances
    contrib = l * jnp.exp(-lv) + lv                # VPU mul/add + EUP exp
    # PyTorch: `if losses[h] == 0: continue`  ->  masked contribution.
    # Zero-padded lanes (loss == 0, log_var == 0) drop out the same way.
    contrib = jnp.where(l != 0.0, contrib, jnp.zeros_like(contrib))
    out_ref[0, 0] = jnp.sum(contrib)               # cross-lane reduce -> SMEM scalar


@functools.partial(jax.jit, static_argnums=())
def mt_loss(loss_vec, log_var_vec):
    """loss_vec, log_var_vec: (H,) f32 per-head losses / log-variances -> scalar."""
    H = loss_vec.shape[0]
    h_pad = max(_LANE, ((H + _LANE - 1) // _LANE) * _LANE)

    # Single packed operand: (2, Hpad). One stack + one pad, one input DMA.
    # TODO(synk): if H ever exceeds 128, repack as (2, Hpad//128, 8, 128)-style
    # sublane-dense tiles and do a sublane VPU reduce before the lane reduce.
    x = jnp.stack([loss_vec.astype(jnp.float32),
                   log_var_vec.astype(jnp.float32)])          # (2, H)
    x = jnp.pad(x, ((0, 0), (0, h_pad - H)))                  # (2, Hpad), zero pad

    out = pl.pallas_call(
        _mt_loss_kernel,
        out_shape=jax.ShapeDtypeStruct((1, 1), jnp.float32),
        in_specs=[pl.BlockSpec(memory_space=pltpu.VMEM)],
        out_specs=pl.BlockSpec(memory_space=pltpu.SMEM),
    )(x)
    return out.reshape(())   # reshape inside jit; fused, no extra dispatch


class MTLoss:
    """JAX mirror of the PyTorch MTLoss module (forward pass only).

    log_vars are kept as a single (H,) array initialized to zeros, matching the
    nn.Parameter(torch.zeros((1,))) init for each head.
    """
    # TODO(synk): parameter learnability / autograd state of nn.Parameter is
    # out of scope for a forward-pass kernel; log_vars are held as a plain array.

    def __init__(self, heads):
        self.heads = list(heads)
        self.log_vars = jnp.zeros((len(self.heads),), jnp.float32)

    def __call__(self, losses):
        if isinstance(losses, dict):
            # Dict interface (mirrors PyTorch call sites) — stacked once here.
            loss_vec = jnp.stack(
                [jnp.asarray(losses[h], jnp.float32).reshape(()) for h in self.heads])
        else:
            # Preferred fast path: already an (H,) array in head order.
            loss_vec = jnp.asarray(losses, jnp.float32)
        return mt_loss(loss_vec, self.log_vars)


def _reference_loss(heads, losses, log_vars):
    """Pure-numpy reference mirroring the PyTorch forward exactly."""
    total = 0.0
    lv_arr = np.asarray(log_vars, np.float64)
    for i, h in enumerate(heads):
        lh = float(losses[h])
        if lh == 0:
            continue
        total += lh * np.exp(-lv_arr[i]) + lv_arr[i]
    return np.float32(total)


if __name__ == "__main__":
    heads = ["hm", "wh", "reg", "dep"]
    key = jax.random.PRNGKey(0)
    k1, k2 = jax.random.split(key)

    # Per-head scalar losses; one head deliberately zero so the
    # `if losses[h] == 0: continue` branch of the module is exercised.
    raw = jax.random.uniform(k1, (len(heads),), minval=0.1, maxval=2.0,
                             dtype=jnp.float32)
    losses = {h: raw[i] for i, h in enumerate(heads)}
    losses["reg"] = jnp.float32(0.0)

    model = MTLoss(heads)
    # Give the (normally learnable) log-variances non-trivial values so the
    # exp(-log_var) weighting is actually tested, not just the zero init.
    model.log_vars = 0.5 * jax.random.normal(k2, (len(heads),), dtype=jnp.float32)

    out = jax.block_until_ready(model(losses))
    ref = _reference_loss(heads, losses, model.log_vars)

    np.testing.assert_allclose(np.asarray(out), ref, rtol=1e-5, atol=1e-6)
    print("KERNEL_OK")
</pallas_src>

<mosaic_0001>
module attributes {stable_mosaic.version = 11 : i64} {
  func.func @_mt_loss_kernel(%arg0: memref<2x128xf32, #tpu.memory_space<vmem>>, %arg1: memref<1x1xf32, #tpu.memory_space<smem>>) attributes {dimension_semantics = [], scalar_prefetch = 0 : i64, scratch_operands = 0 : i64, tpu.core_type = #tpu.core_type<tc>} {
    %c0 = arith.constant 0 : index
    %c0_0 = arith.constant 0 : index
    %0 = vector.load %arg0[%c0, %c0_0] : memref<2x128xf32, #tpu.memory_space<vmem>>, vector<1x128xf32>
    %c1 = arith.constant 1 : index
    %c0_1 = arith.constant 0 : index
    %1 = vector.load %arg0[%c1, %c0_1] : memref<2x128xf32, #tpu.memory_space<vmem>>, vector<1x128xf32>
    %cst = arith.constant 0.000000e+00 : f32
    %2 = vector.broadcast %cst : f32 to vector<1x128xf32>
    %3 = arith.subf %2, %1 : vector<1x128xf32>
    %4 = math.exp %3 : vector<1x128xf32>
    %5 = arith.mulf %0, %4 : vector<1x128xf32>
    %6 = arith.addf %5, %1 : vector<1x128xf32>
    %cst_2 = arith.constant 0.000000e+00 : f32
    %7 = vector.broadcast %cst_2 : f32 to vector<1x128xf32>
    %8 = arith.cmpf one, %0, %7 : vector<1x128xf32>
    %cst_3 = arith.constant 0.000000e+00 : f32
    %9 = vector.broadcast %cst_3 : f32 to vector<1x128xf32>
    %10 = arith.select %8, %6, %9 : vector<1x128xi1>, vector<1x128xf32>
    %11 = vector.shape_cast %10 : vector<1x128xf32> to vector<1x1x128xf32>
    %cst_4 = arith.constant dense<0.000000e+00> : vector<1xf32>
    %12 = vector.multi_reduction <add>, %11, %cst_4 [1, 2] : vector<1x1x128xf32> to vector<1xf32>
    %13 = vector.shape_cast %12 : vector<1xf32> to vector<1x1x1xf32>
    %14 = vector.extract %13[0, 0, 0] : f32 from vector<1x1x1xf32>
    %c0_5 = arith.constant 0 : index
    %c0_6 = arith.constant 0 : index
    %15 = memref.load %arg1[%c0_5, %c0_6] : memref<1x1xf32, #tpu.memory_space<smem>>
    memref.store %14, %arg1[%c0_5, %c0_6] : memref<1x1xf32, #tpu.memory_space<smem>>
    return
  }
}

</mosaic_0001>

<bundles_post_ra>
// kernel: mt_loss.1
= control target key start
LH: loop header
LB: loop body
LE: loop exit
PB: predicated region body
PF: predicated region fallthrough
CT: control target
= control target key end

     0   :  { %s79_s0 = inlined_call_operand.vmem [shape: f32[2,128], index: 0, kind: input, shape index: {}]   ;;  %s80_s1 = inlined_call_operand.hbm [shape: f32[1,1], index: 1, kind: output, shape index: {}]  }
   0x1   :  { %v10_v0 = vld [vmem:[%s79_s0 + $0x1] sm:$0x1] }
   0x2   :  { %v11_v1 = vsub.f32 0.0, %v10_v0 }
   0x3   :  { %6 = vsyncpa [#allocation3], 0  ;;  %v9_v3 = vld [vmem:[%s79_s0] sm:$0x1]  ;;  %vm18_vm1 = vcmask 1040384   ;;  %s59_s11 = smov [#allocation2]  }
   0x4   :  { %v12_v2 = vmul.f32 1.442695, %v11_v1  ;;  %vm16_vm0 = vcmp.ne.f32.partialorder %v9_v3, 0.0 }
   0x6   :  { %47 = vpow2.f32 %v12_v2 }
  0x13   :  { %v48_v4 = vpop.eup %47 }
  0x14   :  { %v14_v5 = vmul.f32 %v48_v4, %v9_v3 }
  0x16   :  { %v15_v6 = vadd.f32 %v14_v5, %v10_v0 }
  0x18   :  { %v17_v7 = vsel %vm16_vm0, %v15_v6, 0.0 }
  0x19   :  { %v19_v8 = vsel %vm18_vm1, %v17_v7, 0.0 }
  0x1a   :  { %20 = vadd.xlane.f32.xlu0 %v19_v8 }
  0xa3   :  { %v21_v9 = vpop.xlane.xlu0 %20 }
  0xa4   :  { %v22_v10 = vrot.slane %v21_v9, 4 }
  0xa6   :  { %v23_v11 = vadd.f32 %v22_v10, %v21_v9 }
  0xa8   :  { %v24_v12 = vrot.slane %v23_v11, 2 }
  0xaa   :  { %v25_v13 = vadd.f32 %v24_v12, %v23_v11 }
  0xac   :  { %v26_v14 = vrot.slane %v25_v13, 1 }
  0xae   :  { %v27_v15 = vadd.f32 %v26_v14, %v25_v13 }
  0xb0   :  { %44 = vpush %v27_v15 }
  0xe1   :  { %s45_s10 = spop %44 }
  0xe2   :  { %30 = sst [smem:[#allocation2]] %s45_s10 }
  0xe3   :  { %38 = dma.smem_to_hbm %s59_s11, 16, %s80_s1, [#allocation3]  }
  0xe4   :  { %57 = dma.done.wait [#allocation3], 16  }
  0xe5   :  { %58 = vsyncadd [#allocation3], 4294967280 }
  0xe6   :  { %42 = sfence }
  0xe7   :  { %43 = vsyncpa [#allocation3], 1 }

</bundles_post_ra>
